<compile_context>
chip_gen: v6e
topology: v6e:2x2x1
jax: 0.10.0
libtpu: 0.0.40
codegen_flags: <defaults>
</compile_context>

<pallas_src>
import jax
import jax.numpy as jnp
from jax.experimental import pallas as pl
from jax.experimental.pallas import tpu as pltpu

HIDDEN = 256
LANE = 128  # fc3 is zero-padded to this many output columns (col 0 is real q)


def _round_up(x, m):
    return (x + m - 1) // m * m


def _num_tensorcores():
    """Best-effort TC-per-chip detection (2 on v7x, 1 on v5e/v6e)."""
    try:
        kind = jax.devices()[0].device_kind.lower()
        if "v7" in kind:
            return 2
    except Exception:
        pass
    return 1


def critic_kernel(x_ref, w1_ref, b1_ref, w2_ref, b2_ref, w3_ref, b3_ref, out_ref):
    # One batch tile per grid step; weights are VMEM-resident (constant index_map).
    w_dt = w2_ref.dtype
    x = x_ref[...]

    # fc1 (single dot over the pre-concatenated [state|action] input)
    h1 = jnp.dot(x.astype(w_dt), w1_ref[...], preferred_element_type=jnp.float32)
    h1 = jnp.maximum(h1 + b1_ref[...].astype(jnp.float32), 0.0)      # [Bt, 256]

    # fc2
    h2 = jnp.dot(h1.astype(w_dt), w2_ref[...], preferred_element_type=jnp.float32)
    h2 = jnp.maximum(h2 + b2_ref[...].astype(jnp.float32), 0.0)      # [Bt, 256]

    # fc3: lane-padded to 128 output columns -> full-lane MXU op + unmasked store.
    q = jnp.dot(h2.astype(w_dt), w3_ref[...], preferred_element_type=jnp.float32)
    out_ref[...] = (q + b3_ref[...].astype(jnp.float32)).astype(out_ref.dtype)


def prepare_critic_params(params, weight_dtype=jnp.bfloat16):
    """One-time prep: lane-pad fc3 and (optionally) cast weights to bf16.

    Call once (outside the training step); biases stay f32 so bias-add/ReLU
    run on the f32 VPU path on every generation.
    """
    w1, b1, w2, b2, w3, b3 = params
    w3p = jnp.zeros((w3.shape[0], LANE), w3.dtype).at[:, :1].set(w3)
    b3p = jnp.zeros((1, LANE), jnp.float32).at[:, :1].set(b3.astype(jnp.float32))
    if weight_dtype is not None:
        w1, w2, w3p = (w.astype(weight_dtype) for w in (w1, w2, w3p))
    return (w1, b1.astype(jnp.float32), w2, b2.astype(jnp.float32), w3p, b3p)


def critic_forward(state, action, prepared_params, *, block_b=2048):
    """state: [B, state_dim], action: [B, action_dim] -> q: [B, 1] (f32)."""
    w1, b1, w2, b2, w3p, b3p = prepared_params

    B = state.shape[0]
    x = jnp.concatenate([state.astype(jnp.float32),
                         action.astype(jnp.float32)], axis=1)         # [B, sd+ad]
    K = x.shape[1]

    # Batch tile selection: multiple of 8, as large as possible; on v7x make
    # sure the grid has >= num_cores steps so both TensorCores get work.
    ncores = _num_tensorcores()
    bp8 = _round_up(B, 8)
    if ncores > 1:
        bb = min(block_b, max(8, _round_up(pl.cdiv(bp8, ncores), 8)))
    else:
        bb = min(block_b, bp8)
    bb = max(8, _round_up(bb, 8))
    Bp = _round_up(B, bb)
    if Bp != B:
        x = jnp.pad(x, ((0, Bp - B), (0, 0)))

    grid = (Bp // bb,)
    const_spec = lambda shape: pl.BlockSpec(shape, lambda i: (0, 0))

    weight_bytes = sum(int(a.size) * a.dtype.itemsize
                       for a in (w1, b1, w2, b2, w3p, b3p))
    cost = pl.CostEstimate(
        flops=2 * Bp * (K * HIDDEN + HIDDEN * HIDDEN + HIDDEN * LANE),
        transcendentals=0,
        bytes_accessed=weight_bytes + Bp * (K + LANE) * 4,
    )

    compiler_params = pltpu.CompilerParams(
        dimension_semantics=("parallel",),               # shard batch across TCs
        vmem_limit_bytes=(96 << 20) if bb > 2048 else None,  # v5e safety for big tiles
    )

    out = pl.pallas_call(
        critic_kernel,
        out_shape=jax.ShapeDtypeStruct((Bp, LANE), jnp.float32),
        grid=grid,
        in_specs=[
            pl.BlockSpec((bb, K), lambda i: (i, 0)),     # x      [Bt, sd+ad]
            const_spec(w1.shape),                        # w1     [sd+ad, 256]
            const_spec(b1.shape),                        # b1     [1, 256]
            const_spec(w2.shape),                        # w2     [256, 256]
            const_spec(b2.shape),                        # b2     [1, 256]
            const_spec(w3p.shape),                       # w3p    [256, 128]
            const_spec(b3p.shape),                       # b3p    [1, 128]
        ],
        out_specs=pl.BlockSpec((bb, LANE), lambda i: (i, 0)),
        compiler_params=compiler_params,
        cost_estimate=cost,
    )(x, w1, b1, w2, b2, w3p, b3p)

    return out[:B, :1]


def init_critic_params(key, state_dim, action_dim, hidden=HIDDEN):
    """Deterministic init mimicking torch.nn.Linear's U(-1/sqrt(fan_in), ...)."""
    def linear(k, fan_in, fan_out):
        kw, kb = jax.random.split(k)
        bound = 1.0 / jnp.sqrt(float(fan_in))
        w = jax.random.uniform(kw, (fan_in, fan_out), jnp.float32,
                               minval=-bound, maxval=bound)
        b = jax.random.uniform(kb, (1, fan_out), jnp.float32,
                               minval=-bound, maxval=bound)
        return w, b

    k1, k2, k3 = jax.random.split(key, 3)
    w1, b1 = linear(k1, state_dim + action_dim, hidden)
    w2, b2 = linear(k2, hidden, hidden)
    w3, b3 = linear(k3, hidden, 1)
    return (w1, b1, w2, b2, w3, b3)


def critic_ref(state, action, params):
    """Pure-JAX f32 reference for correctness checking."""
    w1, b1, w2, b2, w3, b3 = params
    x = jnp.concatenate([state, action], axis=1)
    h1 = jnp.maximum(x @ w1 + b1, 0.0)
    h2 = jnp.maximum(h1 @ w2 + b2, 0.0)
    return h2 @ w3 + b3


if __name__ == "__main__":
    # MountainCarContinuous-v0: state_dim=2, action_dim=1.
    state_dim, action_dim, batch = 2, 1, 8

    key = jax.random.PRNGKey(0)
    k_params, k_state, k_action = jax.random.split(key, 3)

    params = init_critic_params(k_params, state_dim, action_dim)
    state = jax.random.normal(k_state, (batch, state_dim), jnp.float32)
    action = jax.random.uniform(k_action, (batch, action_dim), jnp.float32,
                                minval=-1.0, maxval=1.0)

    q_ref = critic_ref(state, action, params)

    fwd = jax.jit(critic_forward, static_argnames=("block_b",))

    # Exact-precision path (f32 weights): bitwise-close to the PyTorch math.
    params_f32 = prepare_critic_params(params, weight_dtype=None)
    q_f32 = jax.block_until_ready(fwd(state, action, params_f32))
    assert q_f32.shape == (batch, 1), q_f32.shape
    assert jnp.allclose(q_f32, q_ref, atol=1e-5, rtol=1e-5), \
        f"f32 max abs err {jnp.max(jnp.abs(q_f32 - q_ref))}"

    # Default fast path (bf16 weights, f32 accumulation): looser tolerance.
    params_bf16 = prepare_critic_params(params)  # weight_dtype=bf16
    q_bf16 = jax.block_until_ready(fwd(state, action, params_bf16))
    assert q_bf16.shape == (batch, 1), q_bf16.shape
    assert jnp.allclose(q_bf16, q_ref, atol=3e-2, rtol=3e-2), \
        f"bf16 max abs err {jnp.max(jnp.abs(q_bf16 - q_ref))}"

    print("KERNEL_OK")
</pallas_src>

<mosaic_0001>
module attributes {stable_mosaic.version = 11 : i64} {
  func.func @critic_kernel(%arg0: i32, %arg1: memref<8x3xf32, #tpu.memory_space<vmem>>, %arg2: memref<3x256xf32, #tpu.memory_space<vmem>>, %arg3: memref<1x256xf32, #tpu.memory_space<vmem>>, %arg4: memref<256x256xf32, #tpu.memory_space<vmem>>, %arg5: memref<1x256xf32, #tpu.memory_space<vmem>>, %arg6: memref<256x128xf32, #tpu.memory_space<vmem>>, %arg7: memref<1x128xf32, #tpu.memory_space<vmem>>, %arg8: memref<8x128xf32, #tpu.memory_space<vmem>>) attributes {dimension_semantics = [#tpu.dimension_semantics<parallel>], iteration_bounds = array<i64: 1>, scalar_prefetch = 0 : i64, scratch_operands = 0 : i64, tpu.core_type = #tpu.core_type<tc>, window_params = [{transform_indices = @transform_0, window_bounds = array<i64: 8, 3>}, {pipeline_mode = #tpu.pipeline_mode<synchronous>, transform_indices = @transform_1, window_bounds = array<i64: 3, 256>}, {pipeline_mode = #tpu.pipeline_mode<synchronous>, transform_indices = @transform_2, window_bounds = array<i64: 1, 256>}, {pipeline_mode = #tpu.pipeline_mode<synchronous>, transform_indices = @transform_3, window_bounds = array<i64: 256, 256>}, {pipeline_mode = #tpu.pipeline_mode<synchronous>, transform_indices = @transform_4, window_bounds = array<i64: 1, 256>}, {pipeline_mode = #tpu.pipeline_mode<synchronous>, transform_indices = @transform_5, window_bounds = array<i64: 256, 128>}, {pipeline_mode = #tpu.pipeline_mode<synchronous>, transform_indices = @transform_6, window_bounds = array<i64: 1, 128>}, {transform_indices = @transform_7, window_bounds = array<i64: 8, 128>}]} {
    %c0 = arith.constant 0 : index
    %c0_0 = arith.constant 0 : index
    %0 = vector.load %arg1[%c0, %c0_0] : memref<8x3xf32, #tpu.memory_space<vmem>>, vector<8x3xf32>
    %c0_1 = arith.constant 0 : index
    %c0_2 = arith.constant 0 : index
    %1 = vector.load %arg2[%c0_1, %c0_2] : memref<3x256xf32, #tpu.memory_space<vmem>>, vector<3x256xf32>
    %cst = arith.constant dense<0.000000e+00> : vector<8x256xf32>
    %2 = tpu.matmul %0, %1, %cst {dimension_numbers = #tpu.dot_dimension_numbers<[1], [0], [0], [1], [0, 0, 1, 1], [], []>} : vector<8x3xf32>, vector<3x256xf32>, vector<8x256xf32> -> vector<8x256xf32>
    %c0_3 = arith.constant 0 : index
    %c0_4 = arith.constant 0 : index
    %3 = vector.load %arg3[%c0_3, %c0_4] : memref<1x256xf32, #tpu.memory_space<vmem>>, vector<1x256xf32>
    %4 = vector.broadcast %3 : vector<1x256xf32> to vector<8x256xf32>
    %5 = arith.addf %2, %4 : vector<8x256xf32>
    %cst_5 = arith.constant 0.000000e+00 : f32
    %6 = vector.broadcast %cst_5 : f32 to vector<8x256xf32>
    %7 = arith.maximumf %5, %6 : vector<8x256xf32>
    %c0_6 = arith.constant 0 : index
    %c0_7 = arith.constant 0 : index
    %8 = vector.load %arg4[%c0_6, %c0_7] : memref<256x256xf32, #tpu.memory_space<vmem>>, vector<256x256xf32>
    %cst_8 = arith.constant dense<0.000000e+00> : vector<8x256xf32>
    %9 = tpu.matmul %7, %8, %cst_8 {dimension_numbers = #tpu.dot_dimension_numbers<[1], [0], [0], [1], [0, 0, 1, 1], [], []>} : vector<8x256xf32>, vector<256x256xf32>, vector<8x256xf32> -> vector<8x256xf32>
    %c0_9 = arith.constant 0 : index
    %c0_10 = arith.constant 0 : index
    %10 = vector.load %arg5[%c0_9, %c0_10] : memref<1x256xf32, #tpu.memory_space<vmem>>, vector<1x256xf32>
    %11 = vector.broadcast %10 : vector<1x256xf32> to vector<8x256xf32>
    %12 = arith.addf %9, %11 : vector<8x256xf32>
    %cst_11 = arith.constant 0.000000e+00 : f32
    %13 = vector.broadcast %cst_11 : f32 to vector<8x256xf32>
    %14 = arith.maximumf %12, %13 : vector<8x256xf32>
    %c0_12 = arith.constant 0 : index
    %c0_13 = arith.constant 0 : index
    %15 = vector.load %arg6[%c0_12, %c0_13] : memref<256x128xf32, #tpu.memory_space<vmem>>, vector<256x128xf32>
    %cst_14 = arith.constant dense<0.000000e+00> : vector<8x128xf32>
    %16 = tpu.matmul %14, %15, %cst_14 {dimension_numbers = #tpu.dot_dimension_numbers<[1], [0], [0], [1], [0, 0, 1, 1], [], []>} : vector<8x256xf32>, vector<256x128xf32>, vector<8x128xf32> -> vector<8x128xf32>
    %c0_15 = arith.constant 0 : index
    %c0_16 = arith.constant 0 : index
    %17 = vector.load %arg7[%c0_15, %c0_16] : memref<1x128xf32, #tpu.memory_space<vmem>>, vector<1x128xf32>
    %18 = vector.broadcast %17 : vector<1x128xf32> to vector<8x128xf32>
    %19 = arith.addf %16, %18 : vector<8x128xf32>
    %c0_17 = arith.constant 0 : index
    %c0_18 = arith.constant 0 : index
    %20 = vector.load %arg8[%c0_17, %c0_18] : memref<8x128xf32, #tpu.memory_space<vmem>>, vector<8x128xf32>
    tpu.vector_store %arg8[%c0_17, %c0_18], %19 {strides = array<i32>} : memref<8x128xf32, #tpu.memory_space<vmem>>, vector<8x128xf32>,
    return
  }
  func.func @transform_0(%arg0: i32) -> (i32, i32) {
    %c0_i32 = arith.constant 0 : i32
    %c0_i32_0 = arith.constant 0 : i32
    return %arg0, %c0_i32 : i32, i32
  }
  func.func @transform_1(%arg0: i32) -> (i32, i32) {
    %c0_i32 = arith.constant 0 : i32
    %c0_i32_0 = arith.constant 0 : i32
    %c0_i32_1 = arith.constant 0 : i32
    return %c0_i32, %c0_i32_0 : i32, i32
  }
  func.func @transform_2(%arg0: i32) -> (i32, i32) {
    %c0_i32 = arith.constant 0 : i32
    %c0_i32_0 = arith.constant 0 : i32
    %c0_i32_1 = arith.constant 0 : i32
    return %c0_i32, %c0_i32_0 : i32, i32
  }
  func.func @transform_3(%arg0: i32) -> (i32, i32) {
    %c0_i32 = arith.constant 0 : i32
    %c0_i32_0 = arith.constant 0 : i32
    %c0_i32_1 = arith.constant 0 : i32
    return %c0_i32, %c0_i32_0 : i32, i32
  }
  func.func @transform_4(%arg0: i32) -> (i32, i32) {
    %c0_i32 = arith.constant 0 : i32
    %c0_i32_0 = arith.constant 0 : i32
    %c0_i32_1 = arith.constant 0 : i32
    return %c0_i32, %c0_i32_0 : i32, i32
  }
  func.func @transform_5(%arg0: i32) -> (i32, i32) {
    %c0_i32 = arith.constant 0 : i32
    %c0_i32_0 = arith.constant 0 : i32
    %c0_i32_1 = arith.constant 0 : i32
    return %c0_i32, %c0_i32_0 : i32, i32
  }
  func.func @transform_6(%arg0: i32) -> (i32, i32) {
    %c0_i32 = arith.constant 0 : i32
    %c0_i32_0 = arith.constant 0 : i32
    %c0_i32_1 = arith.constant 0 : i32
    return %c0_i32, %c0_i32_0 : i32, i32
  }
  func.func @transform_7(%arg0: i32) -> (i32, i32) {
    %c0_i32 = arith.constant 0 : i32
    %c0_i32_0 = arith.constant 0 : i32
    return %arg0, %c0_i32 : i32, i32
  }
}

</mosaic_0001>

<bundles_post_ra>
// kernel: critic_forward.1
= control target key start
LH: loop header
LB: loop body
LE: loop exit
PB: predicated region body
PF: predicated region fallthrough
CT: control target
= control target key end

     0   :  { %12 = vsyncpa [#allocation3], 0  ;;  %s579_s0 = inlined_call_operand.vmem [shape: f32[8,3], index: 0, kind: input, shape index: {}]   ;;  %s580_s1 = inlined_call_operand.vmem [shape: f32[3,256], index: 1, kind: input, shape index: {}]   ;;  %s581_s2 = inlined_call_operand.vmem [shape: f32[1,256], index: 2, kind: input, shape index: {}]   ;;  %s582_s3 = inlined_call_operand.hbm [shape: f32[256,256], index: 3, kind: input, shape index: {}]   ;;  %s583_s4 = inlined_call_operand.vmem [shape: f32[1,256], index: 4, kind: input, shape index: {}]   ;;  %s584_s5 = inlined_call_operand.hbm [shape: f32[256,128], index: 5, kind: input, shape index: {}]   ;;  %s585_s6 = inlined_call_operand.vmem [shape: f32[1,128], index: 6, kind: input, shape index: {}]   ;;  %s586_s7 = inlined_call_operand.vmem [shape: f32[8,128], index: 7, kind: output, shape index: {}]  }
   0x1   :  { %13 = vsyncpa [#allocation5], 0  ;;  %s508_s24 = smov [#allocation2]  }
   0x2   :  { %s25_s25 = sshll.u32 %s508_s24, 4  ;;  %s26_s25 = int_to_ptr.vmem [resolvable:$true] %s25_s25 }
   0x3   :  { %s472_s26 = scalar_lea.vmem %s26_s25, 8192  ;;  %p477_p1 = scmp.lt.s32.totalorder %s26_s25, %s26_s25 }
   0x4   :  { %p473_p0 = scmp.ne.s32.totalorder %s26_s25, %s472_s26  ;;  %p478_p2 = scmp.lt.s32.totalorder %s472_s26, %s472_s26 }
   0x6   :  { %p479_p3 = por %p478_p2, %p477_p1 }
   0x8   :  { %p480_p4 = pnand %p479_p3, %p473_p0 }
   0xa   :  { %483 = shalt.err (!%p480_p4)
}
   0xb   :  { %s509_s27 = smov 256   ;;  %s510_s28 = smov 16  }
   0xc   :  { %31 = dma.hbm_to_vmem [thread:$0]  %s582_s3, 8192, %s26_s25, [#allocation3], %s509_s27, %s509_s27, %s510_s28  }
   0xd   :  { %s511_s8 = smov [#allocation4]  }
   0xe   :  { %s39_s9 = sshll.u32 %s511_s8, 4  ;;  %s40_s9 = int_to_ptr.vmem [resolvable:$true] %s39_s9 }
   0xf   :  { %s492_s10 = scalar_lea.vmem %s40_s9, 4096  ;;  %p497_p6 = scmp.lt.s32.totalorder %s40_s9, %s40_s9 }
  0x10   :  { %p493_p5 = scmp.ne.s32.totalorder %s40_s9, %s492_s10  ;;  %p498_p7 = scmp.lt.s32.totalorder %s492_s10, %s492_s10 }
  0x12   :  { %p499_p8 = por %p498_p7, %p497_p6 }
  0x14   :  { %p500_p9 = pnand %p499_p8, %p493_p5 }
  0x16   :  { %503 = shalt.err (!%p500_p9)
}
  0x17   :  { %s512_s11 = smov 128   ;;  %s513_s12 = smov 8  }
  0x18   :  { %45 = dma.hbm_to_vmem [thread:$0]  %s584_s5, 4096, %s40_s9, [#allocation5], %s512_s11, %s512_s11, %s513_s12  }
  0x19   :  { %504 = dma.done.wait [#allocation3], 8192  }
  0x1a   :  { %505 = vsyncadd [#allocation3], 4294959104 }
  0x1b   :  { %506 = dma.done.wait [#allocation5], 4096  }
  0x1c   :  { %507 = vsyncadd [#allocation5], 4294963200  ;;  %v514_v0 = vmov 0.0   ;;  %v55_v1 = vld [vmem:[%s580_s1] sm:$0x77]  ;;  %vm74_vm0 = vcmask 1042432  }
  0x1d   :  { %143 = vmatprep.mubr.f32.mxu0 %v514_v0  ;;  %v183_v2 = vld [vmem:[#allocation2 + $0xf8] sm:$0xff]  ;;  %v69_v3 = vcombine.high %v55_v1, %v55_v1  ;;  %v182_v4 = vld [vmem:[#allocation2 + $0xf0] sm:$0xff]  ;;  %v181_v5 = vld [vmem:[#allocation2 + $0xe8] sm:$0xff]  ;;  %vm70_vm1 = vcmask 23552  }
  0x1e   :  { %228 = vmatprep.subr.mxu1 %v183_v2  ;;  %v180_v6 = vld [vmem:[#allocation2 + $0xe0] sm:$0xff]  ;;  %v179_v8 = vld [vmem:[#allocation2 + $0xd8] sm:$0xff]  ;;  %v178_v9 = vld [vmem:[#allocation2 + $0xd0] sm:$0xff] }
  0x1f   :  { %v54_v7 = vld [vmem:[%s579_s0] sm:$0xff]  ;;  %229 = vmatpush1.msra.mxu1 %v182_v4  ;;  %417 = vmatprep.subr.msk.mxu0 %vm74_vm0, %v69_v3  ;;  %v177_v10 = vld [vmem:[#allocation2 + $0xc8] sm:$0xff]  ;;  %v175_v12 = vld [vmem:[#allocation2 + $0xb8] sm:$0xff] }
  0x20   :  { %230 = vmatprep.subr.mxu1 %v181_v5  ;;  %418 = vmatpush1.msk.msra.mxu0 %vm74_vm0, %v55_v1  ;;  %v176_v11 = vld [vmem:[#allocation2 + $0xc0] sm:$0xff]  ;;  %v174_v13 = vld [vmem:[#allocation2 + $0xb0] sm:$0xff]  ;;  %v173_v14 = vld [vmem:[#allocation2 + $0xa8] sm:$0xff] }
  0x21   :  { %231 = vmatpush1.msra.mxu1 %v180_v6  ;;  %419 = vmatmul.mubr.msk.f32.vlgmr.msra.gmra.mxu0 %vm70_vm1, %v54_v7  ;;  %v172_v15 = vld [vmem:[#allocation2 + $0xa0] sm:$0xff]  ;;  %v171_v16 = vld [vmem:[#allocation2 + $0x98] sm:$0xff]  ;;  %v170_v17 = vld [vmem:[#allocation2 + $0x90] sm:$0xff] }
  0x22   :  { %232 = vmatprep.subr.mxu1 %v179_v8  ;;  %v169_v18 = vld [vmem:[#allocation2 + $0x88] sm:$0xff]  ;;  %v168_v19 = vld [vmem:[#allocation2 + $0x80] sm:$0xff]  ;;  %v167_v20 = vld [vmem:[#allocation2 + $0x78] sm:$0xff] }
  0x23   :  { %233 = vmatpush1.msra.mxu1 %v178_v9  ;;  %v166_v21 = vld [vmem:[#allocation2 + $0x70] sm:$0xff]  ;;  %v165_v22 = vld [vmem:[#allocation2 + $0x68] sm:$0xff]  ;;  %v164_v23 = vld [vmem:[#allocation2 + $0x60] sm:$0xff] }
  0x24   :  { %234 = vmatprep.subr.mxu1 %v177_v10  ;;  %v163_v24 = vld [vmem:[#allocation2 + $0x58] sm:$0xff]  ;;  %v162_v25 = vld [vmem:[#allocation2 + $0x50] sm:$0xff]  ;;  %v161_v26 = vld [vmem:[#allocation2 + $0x48] sm:$0xff] }
  0x25   :  { %235 = vmatpush1.msra.mxu1 %v176_v11  ;;  %v160_v27 = vld [vmem:[#allocation2 + $0x40] sm:$0xff]  ;;  %v159_v28 = vld [vmem:[#allocation2 + $0x38] sm:$0xff]  ;;  %v158_v29 = vld [vmem:[#allocation2 + $0x30] sm:$0xff] }
  0x26   :  { %236 = vmatprep.subr.mxu1 %v175_v12  ;;  %v157_v30 = vld [vmem:[#allocation2 + $0x28] sm:$0xff]  ;;  %v156_v31 = vld [vmem:[#allocation2 + $0x20] sm:$0xff]  ;;  %v155_v32 = vld [vmem:[#allocation2 + $0x18] sm:$0xff] }
  0x27   :  { %237 = vmatpush1.msra.mxu1 %v174_v13  ;;  %v154_v33 = vld [vmem:[#allocation2 + $0x10] sm:$0xff]  ;;  %v153_v34 = vld [vmem:[#allocation2 + $0x8] sm:$0xff]  ;;  %v152_v35 = vld [vmem:[#allocation2] sm:$0xff] }
  0x28   :  { %238 = vmatprep.subr.mxu1 %v173_v14  ;;  %v215_v36 = vld [vmem:[#allocation2 + $0x1f8] sm:$0xff]  ;;  %v214_v37 = vld [vmem:[#allocation2 + $0x1f0] sm:$0xff]  ;;  %v213_v38 = vld [vmem:[#allocation2 + $0x1e8] sm:$0xff] }
  0x29   :  { %239 = vmatpush1.msra.mxu1 %v172_v15  ;;  %v212_v39 = vld [vmem:[#allocation2 + $0x1e0] sm:$0xff]  ;;  %v211_v40 = vld [vmem:[#allocation2 + $0x1d8] sm:$0xff]  ;;  %v210_v41 = vld [vmem:[#allocation2 + $0x1d0] sm:$0xff] }
  0x2a   :  { %240 = vmatprep.subr.mxu1 %v171_v16  ;;  %v209_v42 = vld [vmem:[#allocation2 + $0x1c8] sm:$0xff]  ;;  %v208_v43 = vld [vmem:[#allocation2 + $0x1c0] sm:$0xff]  ;;  %v207_v44 = vld [vmem:[#allocation2 + $0x1b8] sm:$0xff] }
  0x2b   :  { %241 = vmatpush1.msra.mxu1 %v170_v17  ;;  %v206_v45 = vld [vmem:[#allocation2 + $0x1b0] sm:$0xff]  ;;  %v205_v46 = vld [vmem:[#allocation2 + $0x1a8] sm:$0xff]  ;;  %v204_v47 = vld [vmem:[#allocation2 + $0x1a0] sm:$0xff] }
  0x2c   :  { %242 = vmatprep.subr.mxu1 %v169_v18  ;;  %v203_v48 = vld [vmem:[#allocation2 + $0x198] sm:$0xff]  ;;  %v202_v49 = vld [vmem:[#allocation2 + $0x190] sm:$0xff]  ;;  %v201_v50 = vld [vmem:[#allocation2 + $0x188] sm:$0xff] }
  0x2d   :  { %243 = vmatpush1.msra.mxu1 %v168_v19  ;;  %v200_v51 = vld [vmem:[#allocation2 + $0x180] sm:$0xff]  ;;  %v199_v52 = vld [vmem:[#allocation2 + $0x178] sm:$0xff]  ;;  %v198_v53 = vld [vmem:[#allocation2 + $0x170] sm:$0xff] }
  0x2e   :  { %244 = vmatprep.subr.mxu1 %v167_v20  ;;  %v197_v54 = vld [vmem:[#allocation2 + $0x168] sm:$0xff]  ;;  %v196_v55 = vld [vmem:[#allocation2 + $0x160] sm:$0xff]  ;;  %v195_v56 = vld [vmem:[#allocation2 + $0x158] sm:$0xff] }
  0x2f   :  { %245 = vmatpush1.msra.mxu1 %v166_v21  ;;  %v194_v57 = vld [vmem:[#allocation2 + $0x150] sm:$0xff]  ;;  %v193_v58 = vld [vmem:[#allocation2 + $0x148] sm:$0xff]  ;;  %v192_v59 = vld [vmem:[#allocation2 + $0x140] sm:$0xff] }
  0x30   :  { %246 = vmatprep.subr.mxu1 %v165_v22  ;;  %v191_v60 = vld [vmem:[#allocation2 + $0x138] sm:$0xff]  ;;  %v190_v61 = vld [vmem:[#allocation2 + $0x130] sm:$0xff]  ;;  %v189_v62 = vld [vmem:[#allocation2 + $0x128] sm:$0xff] }
  0x31   :  { %247 = vmatpush1.msra.mxu1 %v164_v23  ;;  %v188_v63 = vld [vmem:[#allocation2 + $0x120] sm:$0xff]  ;;  %v187_v0 = vld [vmem:[#allocation2 + $0x118] sm:$0xff]  ;;  %v186_v1 = vld [vmem:[#allocation2 + $0x110] sm:$0xff] }
  0x32   :  { %248 = vmatprep.subr.mxu1 %v163_v24  ;;  %v185_v2 = vld [vmem:[#allocation2 + $0x108] sm:$0xff]  ;;  %v184_v3 = vld [vmem:[#allocation2 + $0x100] sm:$0xff]  ;;  %v332_v4 = vld [vmem:[#allocation4 + $0xf8] sm:$0xff] }
  0x33   :  { %249 = vmatpush1.msra.mxu1 %v162_v25  ;;  %v316_v5 = vld [vmem:[#allocation4 + $0x78] sm:$0xff]  ;;  %v331_v6 = vld [vmem:[#allocation4 + $0xf0] sm:$0xff]  ;;  %421 = vmatprep.subr.mxu0 %v332_v4  ;;  %v330_v8 = vld [vmem:[#allocation4 + $0xe8] sm:$0xff] }
  0x34   :  { %250 = vmatprep.subr.mxu1 %v161_v26  ;;  %v315_v7 = vld [vmem:[#allocation4 + $0x70] sm:$0xff]  ;;  %422 = vmatpush3.msra.mxu0 %v316_v5  ;;  %v314_v9 = vld [vmem:[#allocation4 + $0x68] sm:$0xff]  ;;  %v329_v10 = vld [vmem:[#allocation4 + $0xe0] sm:$0xff] }
  0x35   :  { %251 = vmatpush1.msra.mxu1 %v160_v27  ;;  %423 = vmatprep.subr.mxu0 %v331_v6  ;;  %v313_v11 = vld [vmem:[#allocation4 + $0x60] sm:$0xff]  ;;  %v328_v12 = vld [vmem:[#allocation4 + $0xd8] sm:$0xff]  ;;  %v327_v14 = vld [vmem:[#allocation4 + $0xd0] sm:$0xff] }
  0x36   :  { %252 = vmatprep.subr.mxu1 %v159_v28  ;;  %424 = vmatpush3.msra.mxu0 %v315_v7  ;;  %v312_v13 = vld [vmem:[#allocation4 + $0x58] sm:$0xff]  ;;  %v311_v15 = vld [vmem:[#allocation4 + $0x50] sm:$0xff]  ;;  %v326_v16 = vld [vmem:[#allocation4 + $0xc8] sm:$0xff]  ;;  %v58_v28 = vlaneseq }
  0x37   :  { %253 = vmatpush1.msra.mxu1 %v158_v29  ;;  %425 = vmatprep.subr.mxu0 %v330_v8  ;;  %v310_v17 = vld [vmem:[#allocation4 + $0x48] sm:$0xff]  ;;  %v325_v18 = vld [vmem:[#allocation4 + $0xc0] sm:$0xff]  ;;  %v324_v20 = vld [vmem:[#allocation4 + $0xb8] sm:$0xff] }
  0x38   :  { %254 = vmatprep.subr.mxu1 %v157_v30  ;;  %426 = vmatpush3.msra.mxu0 %v314_v9  ;;  %v309_v19 = vld [vmem:[#allocation4 + $0x40] sm:$0xff]  ;;  %v308_v21 = vld [vmem:[#allocation4 + $0x38] sm:$0xff]  ;;  %v323_v22 = vld [vmem:[#allocation4 + $0xb0] sm:$0xff]  ;;  %v59_v29 = vshrl.u32 %v58_v28, 7 }
  0x39   :  { %255 = vmatpush1.msra.mxu1 %v156_v31  ;;  %427 = vmatprep.subr.mxu0 %v329_v10  ;;  %v307_v23 = vld [vmem:[#allocation4 + $0x30] sm:$0xff]  ;;  %v322_v24 = vld [vmem:[#allocation4 + $0xa8] sm:$0xff]  ;;  %v321_v26 = vld [vmem:[#allocation4 + $0xa0] sm:$0xff] }
  0x3a   :  { %256 = vmatprep.subr.mxu1 %v155_v32  ;;  %428 = vmatpush3.msra.mxu0 %v313_v11  ;;  %v306_v25 = vld [vmem:[#allocation4 + $0x28] sm:$0xff]  ;;  %v305_v27 = vld [vmem:[#allocation4 + $0x20] sm:$0xff]  ;;  %v60_v30 = vsub.s32 0, %v59_v29  ;;  %v64_v32 = vsub.s32 1, %v59_v29 }
  0x3b   :  { %257 = vmatpush1.msra.mxu1 %v154_v33  ;;  %429 = vmatprep.subr.mxu0 %v328_v12  ;;  %v56_v31 = vld [vmem:[%s581_s2] sm:$0x3] }
  0x3c   :  { %258 = vmatprep.subr.mxu1 %v153_v34  ;;  %430 = vmatpush3.msra.mxu0 %v312_v13  ;;  %v61_v33 = vrot.slane %v56_v31, %v60_v30  ;;  %v65_v34 = vrot.slane %v56_v31, %v64_v32 }
  0x3d   :  { %259 = vmatpush1.msra.mxu1 %v152_v35  ;;  %431 = vmatprep.subr.mxu0 %v327_v14 }
  0x3e   :  { %260 = vmatprep.subr.mxu1 %v215_v36  ;;  %432 = vmatpush3.msra.mxu0 %v311_v15 }
  0x3f   :  { %261 = vmatpush2.msra.mxu1 %v214_v37  ;;  %433 = vmatprep.subr.mxu0 %v326_v16 }
  0x40   :  { %262 = vmatprep.subr.mxu1 %v213_v38  ;;  %434 = vmatpush3.msra.mxu0 %v310_v17 }
  0x41   :  { %263 = vmatpush2.msra.mxu1 %v212_v39  ;;  %435 = vmatprep.subr.mxu0 %v325_v18 }
  0x42   :  { %264 = vmatprep.subr.mxu1 %v211_v40  ;;  %436 = vmatpush3.msra.mxu0 %v309_v19 }
  0x43   :  { %265 = vmatpush2.msra.mxu1 %v210_v41  ;;  %437 = vmatprep.subr.mxu0 %v324_v20  ;;  %v320_v41 = vld [vmem:[#allocation4 + $0x98] sm:$0xff] }
  0x44   :  { %266 = vmatprep.subr.mxu1 %v209_v42  ;;  %438 = vmatpush3.msra.mxu0 %v308_v21  ;;  %v304_v42 = vld [vmem:[#allocation4 + $0x18] sm:$0xff] }
  0x45   :  { %267 = vmatpush2.msra.mxu1 %v208_v43  ;;  %439 = vmatprep.subr.mxu0 %v323_v22  ;;  %v319_v43 = vld [vmem:[#allocation4 + $0x90] sm:$0xff] }
  0x46   :  { %268 = vmatprep.subr.mxu1 %v207_v44  ;;  %440 = vmatpush3.msra.mxu0 %v307_v23  ;;  %v303_v44 = vld [vmem:[#allocation4 + $0x10] sm:$0xff] }
  0x47   :  { %269 = vmatpush2.msra.mxu1 %v206_v45  ;;  %441 = vmatprep.subr.mxu0 %v322_v24  ;;  %v318_v45 = vld [vmem:[#allocation4 + $0x88] sm:$0xff] }
  0x48   :  { %270 = vmatprep.subr.mxu1 %v205_v46  ;;  %442 = vmatpush3.msra.mxu0 %v306_v25  ;;  %v302_v46 = vld [vmem:[#allocation4 + $0x8] sm:$0xff] }
  0x49   :  { %271 = vmatpush2.msra.mxu1 %v204_v47  ;;  %443 = vmatprep.subr.mxu0 %v321_v26  ;;  %v317_v47 = vld [vmem:[#allocation4 + $0x80] sm:$0xff] }
  0x4a   :  { %272 = vmatprep.subr.mxu1 %v203_v48  ;;  %444 = vmatpush3.msra.mxu0 %v305_v27  ;;  %v301_v48 = vld [vmem:[#allocation4] sm:$0xff] }
  0x4b   :  { %273 = vmatpush2.msra.mxu1 %v202_v49  ;;  %445 = vmatprep.subr.mxu0 %v320_v41  ;;  %v216_v49 = vld [vmem:[%s583_s4] sm:$0x3] }
  0x4c   :  { %274 = vmatprep.subr.mxu1 %v201_v50  ;;  %446 = vmatpush3.msra.mxu0 %v304_v42  ;;  %v221_v50 = vrot.slane %v216_v49, %v60_v30 }
  0x4d   :  { %275 = vmatpush2.msra.mxu1 %v200_v51  ;;  %447 = vmatprep.subr.mxu0 %v319_v43  ;;  %v225_v51 = vrot.slane %v216_v49, %v64_v32 }
  0x4e   :  { %276 = vmatprep.subr.mxu1 %v199_v52  ;;  %448 = vmatpush3.msra.mxu0 %v303_v44 }
  0x4f   :  { %277 = vmatpush2.msra.mxu1 %v198_v53  ;;  %449 = vmatprep.subr.mxu0 %v318_v45 }
  0x50   :  { %278 = vmatprep.subr.mxu1 %v197_v54  ;;  %450 = vmatpush3.msra.mxu0 %v302_v46 }
  0x51   :  { %279 = vmatpush2.msra.mxu1 %v196_v55  ;;  %451 = vmatprep.subr.mxu0 %v317_v47 }
  0x52   :  { %280 = vmatprep.subr.mxu1 %v195_v56  ;;  %452 = vmatpush3.msra.mxu0 %v301_v48 }
  0x53   :  { %281 = vmatpush2.msra.mxu1 %v194_v57 }
  0x54   :  { %282 = vmatprep.subr.mxu1 %v193_v58 }
  0x55   :  { %283 = vmatpush2.msra.mxu1 %v192_v59  ;;  %v420_v59 = vld [vmem:[%s585_s6] ss:$0 sm:$0xff] }
  0x56   :  { %284 = vmatprep.subr.mxu1 %v191_v60 }
  0x57   :  { %285 = vmatpush2.msra.mxu1 %v190_v61 }
  0x58   :  { %286 = vmatprep.subr.mxu1 %v189_v62 }
  0x59   :  { %287 = vmatpush2.msra.mxu1 %v188_v63 }
  0x5a   :  { %288 = vmatprep.subr.mxu1 %v187_v0 }
  0x5b   :  { %289 = vmatpush2.msra.mxu1 %v186_v1 }
  0x5c   :  { %290 = vmatprep.subr.mxu1 %v185_v2 }
  0x5d   :  { %291 = vmatpush2.msra.mxu1 %v184_v3 }
  0xe1   :  { %v145_v35 = vpop.f32.mrf.mxu0 }
  0xe2   :  { %v146_v36 = vadd.f32 %v145_v35, %v61_v33 }
  0xe3   :  { %v147_v37 = vpop.f32.mrf.mxu0 }
  0xe4   :  { %v148_v38 = vadd.f32 %v147_v37, %v65_v34  ;;  %v150_v40 = vmax.f32 %v146_v36, 0.0 }
  0xe6   :  { %v151_v39 = vmax.f32 %v148_v38, 0.0 }
  0xe8   :  { %292 = vmatprep.mubr.f32.mxu1 %v151_v39 }
  0xe9   :  { %293 = vmatmul.mubr.f32.vlgmr.msra.gmra.mxu1 %v150_v40 }
 0x1a9   :  { %v294_v52 = vpop.f32.mrf.mxu1 }
 0x1aa   :  { %v295_v53 = vadd.f32 %v294_v52, %v221_v50 }
 0x1ab   :  { %v296_v54 = vpop.f32.mrf.mxu1 }
 0x1ac   :  { %v297_v55 = vadd.f32 %v296_v54, %v225_v51  ;;  %v299_v57 = vmax.f32 %v295_v53, 0.0 }
 0x1ae   :  { %v300_v56 = vmax.f32 %v297_v55, 0.0 }
 0x1b0   :  { %404 = vmatprep.mubr.f32.mxu0 %v300_v56 }
 0x1b1   :  { %405 = vmatmul.mubr.f32.vlgmr.msra.gmra.mxu0 %v299_v57 }
 0x271   :  { %v453_v58 = vpop.f32.mrf.mxu0 }
 0x273   :  { %v454_v60 = vpop.f32.mrf.mxu0 }
 0x274   :  { %v455_v61 = vadd.f32 %v454_v60, %v453_v58 }
 0x276   :  { %v407_v62 = vadd.f32 %v455_v61, %v420_v59 }
 0x278   :  { %410 = vst [vmem:[%s586_s7] sm:$0xff] %v407_v62 }
 0x279   :  { %415 = vsyncpa [#allocation3], 1 }
 0x27a   :  { %416 = vsyncpa [#allocation5], 1 }

</bundles_post_ra>
